<compile_context>
chip_gen: v7x
topology: tpu7x:2x2x1
jax: 0.10.0
libtpu: 0.0.40
codegen_flags: <defaults>
</compile_context>

<pallas_src>
import functools

import numpy as np
import jax
import jax.numpy as jnp
from jax.experimental import pallas as pl
from jax.experimental.pallas import tpu as pltpu


# ----------------------------------------------------------------------------
# Pair selector (injected object in the PyTorch module).  Pair enumeration is
# variable-length / data-dependent, so it runs host-side.
# ----------------------------------------------------------------------------
class AllPairSelector:
    """All i<j pairs, split into positives (same label) and negatives."""

    def get_pairs(self, embeddings, target):
        del embeddings  # only labels matter for this selector
        t = np.asarray(target)
        n = t.shape[0]
        pos, neg = [], []
        for i in range(n):
            for j in range(i + 1, n):
                (pos if t[i] == t[j] else neg).append((i, j))
        return (np.asarray(pos, dtype=np.int32).reshape(-1, 2),
                np.asarray(neg, dtype=np.int32).reshape(-1, 2))


def _round_up(x, m):
    return ((x + m - 1) // m) * m


# ----------------------------------------------------------------------------
# Pallas kernel: one row-tile of the pairwise loss matrices.
#   rows_ref : (TM, Dpad)    row tile of embeddings
#   et_ref   : (Dpad, Npad)  full transposed embeddings (VMEM-resident)
#   rown_ref : (TM, 1)       squared norms of the row tile
#   coln_ref : (1, Npad)     squared norms of all embeddings
#   pos_ref  : (TM, Npad)    squared euclidean distances  (positive-pair loss)
#   neg_ref  : (TM, Npad)    relu(margin - d)^2           (negative-pair loss)
# ----------------------------------------------------------------------------
def _dist_loss_kernel(rows_ref, et_ref, rown_ref, coln_ref,
                      pos_ref, neg_ref, *, margin):
    a = rows_ref[...]                                                   # (TM, Dpad)
    g = jnp.dot(a, et_ref[...], preferred_element_type=jnp.float32)    # (TM, Npad) on MXU
    # clamp: Gram-formula d2 can go slightly negative from f32 cancellation
    d2 = jnp.maximum(rown_ref[...] + coln_ref[...] - 2.0 * g, 0.0)
    pos_ref[...] = d2
    hinge = jnp.maximum(margin - jnp.sqrt(d2), 0.0)
    neg_ref[...] = hinge * hinge


def pairwise_loss_matrices(embeddings, margin):
    """Returns (pos_mat, neg_mat), each (Npad, Npad) f32:
       pos_mat[i, j] = ||e_i - e_j||^2
       neg_mat[i, j] = relu(margin - ||e_i - e_j||)^2
    """
    n, d = embeddings.shape
    dpad = max(128, _round_up(d, 128))          # lane-aligned contraction dim
    if n <= 256:
        npad = max(8, _round_up(n, 8))
        tm = npad                               # single grid step for small N
    else:
        npad = _round_up(n, 256)
        tm = 256                                # 256-row tiles for large N

    e = jnp.zeros((npad, dpad), jnp.float32).at[:n, :d].set(
        embeddings.astype(jnp.float32))
    et = e.T                                    # (Dpad, Npad), resident in VMEM
    norms = jnp.sum(e * e, axis=1)              # (Npad,)
    row_norms = norms[:, None]                  # (Npad, 1)
    col_norms = norms[None, :]                  # (1, Npad)

    kernel = functools.partial(_dist_loss_kernel, margin=float(margin))

    pos_mat, neg_mat = pl.pallas_call(
        kernel,
        out_shape=(jax.ShapeDtypeStruct((npad, npad), jnp.float32),
                   jax.ShapeDtypeStruct((npad, npad), jnp.float32)),
        grid_spec=pltpu.PrefetchScalarGridSpec(
            num_scalar_prefetch=0,
            grid=(npad // tm,),
            in_specs=[
                pl.BlockSpec((tm, dpad), lambda i: (i, 0)),   # row tile
                pl.BlockSpec((dpad, npad), lambda i: (0, 0)), # resident E^T
                pl.BlockSpec((tm, 1), lambda i: (i, 0)),      # row norms
                pl.BlockSpec((1, npad), lambda i: (0, 0)),    # col norms
            ],
            out_specs=[
                pl.BlockSpec((tm, npad), lambda i: (i, 0)),
                pl.BlockSpec((tm, npad), lambda i: (i, 0)),
            ],
        ),
        compiler_params=pltpu.CompilerParams(
            dimension_semantics=("parallel",)),   # row tiles independent (v7x 2-TC)
    )(e, et, row_norms, col_norms)
    return pos_mat, neg_mat


# ----------------------------------------------------------------------------
# Module equivalent
# ----------------------------------------------------------------------------
class OnlineContrastiveEucLoss:
    def __init__(self, margin, pair_selector):
        self.margin = margin
        self.pair_selector = pair_selector

    def forward(self, embeddings, target):
        # TODO(synk): pair enumeration is data-dependent / variable-length and
        # runs host-side (same role as the injected selector in PyTorch).
        pos_pairs, neg_pairs = self.pair_selector.get_pairs(embeddings, target)

        pos_mat, neg_mat = pairwise_loss_matrices(embeddings, self.margin)

        pos_idx = jnp.asarray(pos_pairs, dtype=jnp.int32)
        neg_idx = jnp.asarray(neg_pairs, dtype=jnp.int32)
        positive_loss = pos_mat[pos_idx[:, 0], pos_idx[:, 1]]
        negative_loss = neg_mat[neg_idx[:, 0], neg_idx[:, 1]]
        loss = jnp.concatenate([positive_loss, negative_loss], axis=0)
        return [loss.mean(),
                positive_loss.mean(),
                negative_loss.mean(),
                [pos_idx, neg_idx],
                int(pos_pairs.shape[0]) + int(neg_pairs.shape[0])]


# ----------------------------------------------------------------------------
if __name__ == "__main__":
    key = jax.random.PRNGKey(0)
    N, D = 8, 32
    margin = 10.0   # large enough that the hinge is active for random normals

    embeddings = jax.random.normal(key, (N, D), dtype=jnp.float32)
    target = jnp.array([0, 0, 1, 1, 0, 1, 0, 1], dtype=jnp.int32)

    loss_mod = OnlineContrastiveEucLoss(margin, AllPairSelector())
    out = loss_mod.forward(embeddings, target)
    jax.block_until_ready(out[0])
    jax.block_until_ready(out[1])
    jax.block_until_ready(out[2])

    # --- plain-numpy reference check of the forward semantics ---------------
    emb = np.asarray(embeddings)
    pos_pairs, neg_pairs = loss_mod.pair_selector.get_pairs(embeddings, target)
    pos_ref = ((emb[pos_pairs[:, 0]] - emb[pos_pairs[:, 1]]) ** 2).sum(1)
    neg_d = np.sqrt(((emb[neg_pairs[:, 0]] - emb[neg_pairs[:, 1]]) ** 2).sum(1))
    neg_ref = np.maximum(margin - neg_d, 0.0) ** 2
    all_ref = np.concatenate([pos_ref, neg_ref], axis=0)

    assert np.allclose(float(out[0]), all_ref.mean(), rtol=1e-4, atol=1e-4)
    assert np.allclose(float(out[1]), pos_ref.mean(), rtol=1e-4, atol=1e-4)
    assert np.allclose(float(out[2]), neg_ref.mean(), rtol=1e-4, atol=1e-4)
    assert out[4] == len(pos_pairs) + len(neg_pairs)

    print("KERNEL_OK")
</pallas_src>

<mosaic_0001>
module attributes {stable_mosaic.version = 11 : i64} {
  func.func @_dist_loss_kernel(%arg0: i32, %arg1: memref<8x128xf32, #tpu.memory_space<vmem>>, %arg2: memref<128x8xf32, #tpu.memory_space<vmem>>, %arg3: memref<8x1xf32, #tpu.memory_space<vmem>>, %arg4: memref<1x8xf32, #tpu.memory_space<vmem>>, %arg5: memref<8x8xf32, #tpu.memory_space<vmem>>, %arg6: memref<8x8xf32, #tpu.memory_space<vmem>>) attributes {dimension_semantics = [#tpu.dimension_semantics<parallel>], iteration_bounds = array<i64: 1>, scalar_prefetch = 0 : i64, scratch_operands = 0 : i64, tpu.core_type = #tpu.core_type<tc>, window_params = [{transform_indices = @transform_0, window_bounds = array<i64: 8, 128>}, {pipeline_mode = #tpu.pipeline_mode<synchronous>, transform_indices = @transform_1, window_bounds = array<i64: 128, 8>}, {transform_indices = @transform_2, window_bounds = array<i64: 8, 1>}, {pipeline_mode = #tpu.pipeline_mode<synchronous>, transform_indices = @transform_3, window_bounds = array<i64: 1, 8>}, {transform_indices = @transform_4, window_bounds = array<i64: 8, 8>}, {transform_indices = @transform_5, window_bounds = array<i64: 8, 8>}]} {
    %c0 = arith.constant 0 : index
    %c0_0 = arith.constant 0 : index
    %0 = vector.load %arg1[%c0, %c0_0] : memref<8x128xf32, #tpu.memory_space<vmem>>, vector<8x128xf32>
    %c0_1 = arith.constant 0 : index
    %c0_2 = arith.constant 0 : index
    %1 = vector.load %arg2[%c0_1, %c0_2] : memref<128x8xf32, #tpu.memory_space<vmem>>, vector<128x8xf32>
    %cst = arith.constant dense<0.000000e+00> : vector<8x8xf32>
    %2 = tpu.matmul %0, %1, %cst {dimension_numbers = #tpu.dot_dimension_numbers<[1], [0], [0], [1], [0, 0, 1, 1], [], []>} : vector<8x128xf32>, vector<128x8xf32>, vector<8x8xf32> -> vector<8x8xf32>
    %c0_3 = arith.constant 0 : index
    %c0_4 = arith.constant 0 : index
    %3 = vector.load %arg3[%c0_3, %c0_4] : memref<8x1xf32, #tpu.memory_space<vmem>>, vector<8x1xf32>
    %c0_5 = arith.constant 0 : index
    %c0_6 = arith.constant 0 : index
    %4 = vector.load %arg4[%c0_5, %c0_6] : memref<1x8xf32, #tpu.memory_space<vmem>>, vector<1x8xf32>
    %5 = vector.broadcast %3 : vector<8x1xf32> to vector<8x8xf32>
    %6 = vector.broadcast %4 : vector<1x8xf32> to vector<8x8xf32>
    %7 = arith.addf %5, %6 : vector<8x8xf32>
    %cst_7 = arith.constant 2.000000e+00 : f32
    %8 = vector.broadcast %cst_7 : f32 to vector<8x8xf32>
    %9 = arith.mulf %8, %2 : vector<8x8xf32>
    %10 = arith.subf %7, %9 : vector<8x8xf32>
    %cst_8 = arith.constant 0.000000e+00 : f32
    %11 = vector.broadcast %cst_8 : f32 to vector<8x8xf32>
    %12 = arith.maximumf %10, %11 : vector<8x8xf32>
    %c0_9 = arith.constant 0 : index
    %c0_10 = arith.constant 0 : index
    %13 = vector.load %arg5[%c0_9, %c0_10] : memref<8x8xf32, #tpu.memory_space<vmem>>, vector<8x8xf32>
    tpu.vector_store %arg5[%c0_9, %c0_10], %12 {strides = array<i32>} : memref<8x8xf32, #tpu.memory_space<vmem>>, vector<8x8xf32>,
    %14 = math.sqrt %12 : vector<8x8xf32>
    %cst_11 = arith.constant 1.000000e+01 : f32
    %15 = vector.broadcast %cst_11 : f32 to vector<8x8xf32>
    %16 = arith.subf %15, %14 : vector<8x8xf32>
    %cst_12 = arith.constant 0.000000e+00 : f32
    %17 = vector.broadcast %cst_12 : f32 to vector<8x8xf32>
    %18 = arith.maximumf %16, %17 : vector<8x8xf32>
    %19 = arith.mulf %18, %18 : vector<8x8xf32>
    %c0_13 = arith.constant 0 : index
    %c0_14 = arith.constant 0 : index
    %20 = vector.load %arg6[%c0_13, %c0_14] : memref<8x8xf32, #tpu.memory_space<vmem>>, vector<8x8xf32>
    tpu.vector_store %arg6[%c0_13, %c0_14], %19 {strides = array<i32>} : memref<8x8xf32, #tpu.memory_space<vmem>>, vector<8x8xf32>,
    return
  }
  func.func @transform_0(%arg0: i32) -> (i32, i32) {
    %c0_i32 = arith.constant 0 : i32
    %c0_i32_0 = arith.constant 0 : i32
    return %arg0, %c0_i32 : i32, i32
  }
  func.func @transform_1(%arg0: i32) -> (i32, i32) {
    %c0_i32 = arith.constant 0 : i32
    %c0_i32_0 = arith.constant 0 : i32
    %c0_i32_1 = arith.constant 0 : i32
    return %c0_i32, %c0_i32_0 : i32, i32
  }
  func.func @transform_2(%arg0: i32) -> (i32, i32) {
    %c0_i32 = arith.constant 0 : i32
    %c0_i32_0 = arith.constant 0 : i32
    return %arg0, %c0_i32 : i32, i32
  }
  func.func @transform_3(%arg0: i32) -> (i32, i32) {
    %c0_i32 = arith.constant 0 : i32
    %c0_i32_0 = arith.constant 0 : i32
    %c0_i32_1 = arith.constant 0 : i32
    return %c0_i32, %c0_i32_0 : i32, i32
  }
  func.func @transform_4(%arg0: i32) -> (i32, i32) {
    %c0_i32 = arith.constant 0 : i32
    %c0_i32_0 = arith.constant 0 : i32
    return %arg0, %c0_i32 : i32, i32
  }
  func.func @transform_5(%arg0: i32) -> (i32, i32) {
    %c0_i32 = arith.constant 0 : i32
    %c0_i32_0 = arith.constant 0 : i32
    return %arg0, %c0_i32 : i32, i32
  }
}

</mosaic_0001>

<bundles_post_ra>
// kernel: tpu_custom_call.1
= control target key start
LH: loop header
LB: loop body
LE: loop exit
PB: predicated region body
PF: predicated region fallthrough
CT: control target
= control target key end

     0   :  { %11 = vsyncpa [#allocation3], 0  ;;  %v300_v3 = vmov 0.0|0.0   ;;  %vm301_vm0 = vmmov 0   ;;  %v302_v6 = vmov 0.0   ;;  %v303_v7 = vmov 0   ;;  %s419_s0 = inlined_call_operand.vmem [shape: f32[8,128], index: 0, kind: input, shape index: {}]   ;;  %s420_s1 = inlined_call_operand.vmem [shape: f32[128,8], index: 1, kind: input, shape index: {}]   ;;  %s421_s2 = inlined_call_operand.vmem [shape: f32[8,1], index: 2, kind: input, shape index: {}]   ;;  %s422_s3 = inlined_call_operand.vmem [shape: f32[1,8], index: 3, kind: input, shape index: {}]   ;;  %s423_s4 = inlined_call_operand.hbm [shape: f32[8,8], index: 4, kind: output, shape index: {0}]   ;;  %s424_s5 = inlined_call_operand.hbm [shape: f32[8,8], index: 5, kind: output, shape index: {1}]  }
   0x1   :  { %v22_v0 = vld [vmem:[%s420_s1] sm:$0xff]  ;;  %v23_v1 = vld [vmem:[%s420_s1 + $0x8] sm:$0xff]  ;;  %v24_v2 = vld [vmem:[%s420_s1 + $0x10] sm:$0xff]  ;;  %219 = vmatprep.subr.bf16.mxu0 %v300_v3  ;;  %216 = vmatprep.mubr.msk.f32.mxu0 %vm301_vm0, %v302_v6 }
   0x2   :  { %v220_v4 = vpack.c.bf16 %v23_v1, %v22_v0  ;;  %v25_v5 = vld [vmem:[%s420_s1 + $0x18] sm:$0xff]  ;;  %249 = vset.pattern.permute.xlu0 %v303_v7  ;;  %v26_v9 = vld [vmem:[%s420_s1 + $0x20] sm:$0xff]  ;;  %v27_v10 = vld [vmem:[%s420_s1 + $0x28] sm:$0xff] }
   0x3   :  { %v223_v8 = vpack.c.bf16 %v25_v5, %v24_v2  ;;  %v108_v11 = vld [vmem:[%s421_s2] sm:$0xff] }
   0x4   :  { %221 = vmatpush3.bf16.msra.mxu0 %v220_v4  ;;  %112 = vperm.xlu0 %249, %v108_v11  }
   0x5   :  { %222 = vmatprep.subr.bf16.mxu0 %v300_v3 }
   0x6   :  { %12 = vsyncpa [#allocation5], 0  ;;  %v226_v12 = vpack.c.bf16 %v27_v10, %v26_v9  ;;  %v28_v13 = vld [vmem:[%s420_s1 + $0x30] sm:$0xff]  ;;  %v29_v14 = vld [vmem:[%s420_s1 + $0x38] sm:$0xff]  ;;  %s304_s30 = smov [#allocation2]   ;;  %vm125_vm1 = vcmask 64512  }
   0x7   :  { %v229_v15 = vpack.c.bf16 %v29_v14, %v28_v13  ;;  %v30_v16 = vld [vmem:[%s420_s1 + $0x40] sm:$0xff]  ;;  %v31_v17 = vld [vmem:[%s420_s1 + $0x48] sm:$0xff]  ;;  %v32_v19 = vld [vmem:[%s420_s1 + $0x50] sm:$0xff] }
   0x8   :  { %224 = vmatpush3.bf16.msra.mxu0 %v223_v8  ;;  %v232_v18 = vpack.c.bf16 %v31_v17, %v30_v16  ;;  %v33_v20 = vld [vmem:[%s420_s1 + $0x58] sm:$0xff]  ;;  %v34_v22 = vld [vmem:[%s420_s1 + $0x60] sm:$0xff]  ;;  %v35_v23 = vld [vmem:[%s420_s1 + $0x68] sm:$0xff] }
   0x9   :  { %225 = vmatprep.subr.bf16.mxu0 %v300_v3  ;;  %v235_v21 = vpack.c.bf16 %v33_v20, %v32_v19  ;;  %v238_v24 = vpack.c.bf16 %v35_v23, %v34_v22  ;;  %v36_v25 = vld [vmem:[%s420_s1 + $0x70] sm:$0xff]  ;;  %v37_v26 = vld [vmem:[%s420_s1 + $0x78] sm:$0xff]  ;;  %v21_v28 = vld [vmem:[%s419_s0] sm:$0xff]  ;;  %s144_s1 = sshll.u32 %s304_s30, 4  ;;  %s145_s1 = int_to_ptr.vmem [resolvable:$true] %s144_s1 }
   0xa   :  { %v241_v27 = vpack.c.bf16 %v37_v26, %v36_v25  ;;  %v166_v29 = vld [vmem:[%s422_s3] ss:$0 sm:$0xff]  ;;  %s252_s0 = scalar_lea.vmem %s145_s1, 128  ;;  %p257_p1 = scmp.lt.s32.totalorder %s145_s1, %s145_s1 }
   0xb   :  { %p253_p0 = scmp.ne.s32.totalorder %s145_s1, %s252_s0  ;;  %p258_p2 = scmp.lt.s32.totalorder %s252_s0, %s252_s0 }
   0xc   :  { %227 = vmatpush3.bf16.msra.mxu0 %v226_v12 }
   0xd   :  { %228 = vmatprep.subr.bf16.mxu0 %v300_v3  ;;  %p259_p3 = por %p258_p2, %p257_p1 }
   0xf   :  { %p260_p4 = pnand %p259_p3, %p253_p0 }
  0x10   :  { %230 = vmatpush3.bf16.msra.mxu0 %v229_v15 }
  0x11   :  { %231 = vmatprep.subr.bf16.mxu0 %v300_v3 }
  0x14   :  { %233 = vmatpush3.bf16.msra.mxu0 %v232_v18 }
  0x15   :  { %234 = vmatprep.subr.bf16.mxu0 %v300_v3 }
  0x18   :  { %236 = vmatpush3.bf16.msra.mxu0 %v235_v21 }
  0x19   :  { %237 = vmatprep.subr.bf16.mxu0 %v300_v3 }
  0x1c   :  { %239 = vmatpush3.bf16.msra.mxu0 %v238_v24 }
  0x1d   :  { %240 = vmatprep.subr.bf16.mxu0 %v300_v3 }
  0x20   :  { %242 = vmatpush3.bf16.msra.mxu0 %v241_v27 }
  0x23   :  { %217 = vmatmul.mubr.f32.vlgmr.msra.gmra.mrb[0].mxu0 %v21_v28 }
  0x83   :  { %v113_v30 = vpop.permute.xlu0 %112 }
  0x84   :  { %v121_v31 = vadd.f32 %v166_v29, %v113_v30 }
  0xf6   :  { %v104_v32 = vpop.f32.mrb[0].mxu0 }
  0xf7   :  { %v122_v33 = vmul.f32 2.0, %v104_v32  ;;  %v218_v34 = vpop.f32.mrb[1].mxu0 }
  0xf9   :  { %v123_v35 = vsub.f32 %v121_v31, %v122_v33 }
  0xfb   :  { %v124_v36 = vmax.f32 %v123_v35, 0.0 }
  0xfd   :  { %126 = vst.msk [vmem:[#allocation2] sm:$0xff] %vm125_vm1, %v124_v36  ;;  %250 = vrsqrt.f32 %v124_v36 }
  0xfe   :  { %263 = shalt.err (!%p260_p4)
}
  0xff   :  { %s264_s7 = scalar_lea.hbm %s423_s4, 128 }
 0x100   :  { %p265_p5 = scmp.ne.s32.totalorder %s423_s4, %s264_s7  ;;  %p268_p6 = scmp.lt.u32.totalorder %s264_s7, %s423_s4 }
 0x102   :  { %p270_p7 = pnand %p268_p6, %p265_p5 }
 0x104   :  { %273 = shalt.err (!%p270_p7)
}
 0x105   :  { %147 = dma.vmem_to_hbm [thread:$0]  %s145_s1, 128, %s423_s4, [#allocation3]   ;;  %vm129_vm2 = vcmp.eq.f32.partialorder %v124_v36, inf  ;;  %v132_v39 = vand.u32 2147483648, %v124_v36  ;;  %vm131_vm3 = vcmp.eq.f32.partialorder %v124_v36, 0.0 }
 0x106   :  { %s305_s13 = smov [#allocation4]  }
 0x107   :  { %v251_v37 = vpop.eup %250  ;;  %s154_s14 = sshll.u32 %s305_s13, 4  ;;  %s155_s14 = int_to_ptr.vmem [resolvable:$true] %s154_s14 }
 0x108   :  { %v128_v38 = vmul.f32 %v251_v37, %v124_v36  ;;  %s274_s15 = scalar_lea.vmem %s155_s14, 128  ;;  %p279_p9 = scmp.lt.s32.totalorder %s155_s14, %s155_s14 }
 0x109   :  { %p275_p8 = scmp.ne.s32.totalorder %s155_s14, %s274_s15  ;;  %p280_p10 = scmp.lt.s32.totalorder %s274_s15, %s274_s15 }
 0x10a   :  { %v130_v40 = vsel %vm129_vm2, %v124_v36, %v128_v38 }
 0x10b   :  { %v133_v41 = vsel %vm131_vm3, %v132_v39, %v130_v40  ;;  %p281_p11 = por %p280_p10, %p279_p9 }
 0x10c   :  { %v134_v42 = vsub.f32 10.0, %v133_v41 }
 0x10d   :  { %p282_p12 = pnand %p281_p11, %p275_p8 }
 0x10e   :  { %v135_v43 = vmax.f32 %v134_v42, 0.0 }
 0x110   :  { %v136_v44 = vmul.f32 %v135_v43, %v135_v43 }
 0x112   :  { %137 = vst.msk [vmem:[#allocation4] sm:$0xff] %vm125_vm1, %v136_v44 }
 0x113   :  { %285 = shalt.err (!%p282_p12)
}
 0x114   :  { %s286_s17 = scalar_lea.hbm %s424_s5, 128 }
 0x115   :  { %p287_p13 = scmp.ne.s32.totalorder %s424_s5, %s286_s17  ;;  %p290_p0 = scmp.lt.u32.totalorder %s286_s17, %s424_s5 }
 0x117   :  { %p292_p1 = pnand %p290_p0, %p287_p13 }
 0x119   :  { %295 = shalt.err (!%p292_p1)
}
 0x11a   :  { %157 = dma.vmem_to_hbm [thread:$0]  %s155_s14, 128, %s424_s5, [#allocation5]  }
 0x11b   :  { %296 = dma.done.wait [#allocation3], 128  }
 0x11c   :  { %297 = vsyncadd [#allocation3], 4294967168 }
 0x11d   :  { %298 = dma.done.wait [#allocation5], 128  }
 0x11e   :  { %299 = vsyncadd [#allocation5], 4294967168 }
 0x11f   :  { %164 = vsyncpa [#allocation3], 1 }
 0x120   :  { %165 = vsyncpa [#allocation5], 1 }

</bundles_post_ra>
